<compile_context>
chip_gen: v5e
topology: v5e:2x2
jax: 0.10.0
libtpu: 0.0.40
codegen_flags: <defaults>
</compile_context>

<pallas_src>
import functools

import jax
import jax.numpy as jnp
from jax import lax
from jax.experimental import pallas as pl
from jax.experimental.pallas import tpu as pltpu


_LANE_CHUNK = 512                    # inner-loop chunk along the pixel/lane axis
_VMEM_BUDGET = 24 * 1024 * 1024      # headroom under the 32 MiB default scoped VMEM
_MIN_GRID_STEPS = 8                  # keep the grid non-degenerate (v7x: 2 TCs)


def _cdiv(a, b):
    return (a + b - 1) // b


def _round_up(x, m):
    return ((x + m - 1) // m) * m


def _seg_head_kernel(x_ref, w1_ref, b1_ref, w2_ref, b2_ref, o_ref):
    # x_ref:  (C_in, tm)    -- channels on sublanes, pixels on lanes (lane-dense)
    # w1_ref: (C_h, C_in)   b1_ref: (C_h, 1)
    # w2_ref: (C_out, C_h)  b2_ref: (C_out, 1)
    # o_ref:  (C_out, tm)
    c_h = w1_ref.shape[0]
    c_out = w2_ref.shape[0]
    tm = x_ref.shape[-1]

    # Wrapper guarantees: tm is a multiple of _LANE_CHUNK when tm > _LANE_CHUNK,
    # otherwise the whole tile is a single chunk.
    lc = min(_LANE_CHUNK, tm)
    n_chunks = tm // lc

    # Weights live in vregs for the whole tile.  Both dots are in the natural
    # MXU (M,K)@(K,N) orientation, so no per-chunk vxpose should be emitted.
    w1 = w1_ref[...]
    w2 = w2_ref[...]
    # Hoist bias broadcasts out of the chunk loop (JAX does not CSE broadcasts).
    b1 = jnp.broadcast_to(b1_ref[...], (c_h, lc))
    b2 = jnp.broadcast_to(b2_ref[...], (c_out, lc))

    def chunk(c, carry):
        start = pl.multiple_of(c * lc, lc)
        xc = x_ref[:, pl.ds(start, lc)]                       # (C_in, lc)
        h = jnp.dot(w1, xc, preferred_element_type=jnp.float32) + b1
        h = jnp.maximum(h, 0.0)                               # ReLU (f32, VPU)
        y = jnp.dot(w2, h, preferred_element_type=jnp.float32) + b2
        o_ref[:, pl.ds(start, lc)] = jax.nn.sigmoid(y).astype(o_ref.dtype)
        return carry

    # Partial unroll: enough LLO scheduling visibility without blowing the
    # 64-vreg file / instruction footprint when there are 32-128 chunks.
    lax.fori_loop(0, n_chunks, chunk, 0, unroll=min(4, n_chunks))


@functools.partial(jax.jit, static_argnames=("tm_target", "out_dtype"))
def simple_seg_head(x, w1, b1, w2, b2, *, tm_target=65536, out_dtype=None):
    """Fused 1x1-conv MLP segmentation head.

    x:  (N, C_in, H, W) float32 (NCHW, as in PyTorch)
    w1: (C_h, C_in)   -- Conv2d weight (out, in, 1, 1) squeezed
    b1: (C_h,)
    w2: (C_out, C_h)
    b2: (C_out,)
    Returns (N, C_out, H, W) in out_dtype (defaults to x.dtype).
    """
    N, C_in, H, W = x.shape
    C_h = w1.shape[0]
    C_out = w2.shape[0]
    HW = H * W
    out_dtype = x.dtype if out_dtype is None else out_dtype

    # Free reshape: NCHW -> (N, C_in, H*W). No transpose / extra HBM pass.
    x3 = x.reshape(N, C_in, HW)

    # --- pixel (lane) tile selection ---------------------------------------
    #  (a) respect tm_target,
    #  (b) keep >= _MIN_GRID_STEPS total grid steps (v7x megacore),
    #  (c) keep tm a multiple of _LANE_CHUNK when tm > _LANE_CHUNK so the
    #      in-kernel chunk loop divides evenly (else a multiple of 128),
    #  (d) stay under the VMEM budget (double-buffered in+out tiles).
    # No padding of HW: cdiv grid + Pallas partial last-block handling.
    n_tiles = max(_cdiv(HW, tm_target), _cdiv(_MIN_GRID_STEPS, max(N, 1)))
    tm = _round_up(_cdiv(HW, n_tiles), 128)
    if tm > _LANE_CHUNK:
        tm = _round_up(tm, _LANE_CHUNK)
    single = _round_up(HW, 128)                 # one tile covering all pixels
    if single > _LANE_CHUNK:
        single = _round_up(single, _LANE_CHUNK)
    tm = min(tm, single)
    bytes_per_lane = 2 * 4 * (C_in + C_out)     # double-buffered in+out, f32
    tm_cap = max(_LANE_CHUNK,
                 (_VMEM_BUDGET // bytes_per_lane) // _LANE_CHUNK * _LANE_CHUNK)
    tm = min(tm, tm_cap)

    grid = (N, _cdiv(HW, tm))

    b1_2d = b1.reshape(C_h, 1)
    b2_2d = b2.reshape(C_out, 1)

    cost = pl.CostEstimate(
        flops=2 * N * HW * (C_in * C_h + C_h * C_out),
        transcendentals=2 * N * HW * C_out,     # sigmoid ~ exp + reciprocal
        bytes_accessed=4 * N * HW * C_in
        + jnp.dtype(out_dtype).itemsize * N * HW * C_out
        + 4 * (C_in * C_h + C_h + C_h * C_out + C_out),
    )

    out3 = pl.pallas_call(
        _seg_head_kernel,
        out_shape=jax.ShapeDtypeStruct((N, C_out, HW), out_dtype),
        grid_spec=pltpu.PrefetchScalarGridSpec(
            num_scalar_prefetch=0,
            grid=grid,
            in_specs=[
                # Input tile: channels on sublanes, lane-dense pixel axis.
                # (If profiling on v7x shows exposed DMA at step boundaries,
                #  add pipeline_mode=pl.Buffered(3) here.)
                pl.BlockSpec((None, C_in, tm), lambda n, i: (n, 0, i)),
                # Weights / biases: constant index_map -> stay VMEM-resident.
                pl.BlockSpec((C_h, C_in), lambda n, i: (0, 0)),
                pl.BlockSpec((C_h, 1), lambda n, i: (0, 0)),
                pl.BlockSpec((C_out, C_h), lambda n, i: (0, 0)),
                pl.BlockSpec((C_out, 1), lambda n, i: (0, 0)),
            ],
            out_specs=pl.BlockSpec((None, C_out, tm), lambda n, i: (n, 0, i)),
        ),
        compiler_params=pltpu.CompilerParams(
            dimension_semantics=("parallel", "parallel"),
        ),
        cost_estimate=cost,
    )(x3, w1, b1_2d, w2, b2_2d)

    # Free reshape back to NCHW (HW is exact -- no slicing pass).
    return out3.reshape(N, C_out, H, W)


def _reference(x, w1, b1, w2, b2):
    # Pure-JAX reference of the same 1x1-conv MLP head, NCHW in/out.
    h = jnp.einsum("oc,nchw->nohw", w1, x) + b1[None, :, None, None]
    h = jnp.maximum(h, 0.0)
    y = jnp.einsum("oc,nchw->nohw", w2, h) + b2[None, :, None, None]
    return jax.nn.sigmoid(y)


if __name__ == "__main__":
    # Small shapes consistent with the module: dims=2 (Conv2d path),
    # in_channels=4 (base_encoder.out_channels), h_channels=32, out_channels=3.
    N, C_in, H, W = 2, 4, 16, 16
    C_h, C_out = 32, 3

    key = jax.random.PRNGKey(0)
    kx, kw1, kb1, kw2, kb2 = jax.random.split(key, 5)

    x = jax.random.normal(kx, (N, C_in, H, W), dtype=jnp.float32)
    # Conv2d weights with kernel size 1: (out, in, 1, 1) -> stored as (out, in).
    w1 = jax.random.normal(kw1, (C_h, C_in), dtype=jnp.float32) * 0.1
    b1 = jax.random.normal(kb1, (C_h,), dtype=jnp.float32) * 0.1
    w2 = jax.random.normal(kw2, (C_out, C_h), dtype=jnp.float32) * 0.1
    b2 = jax.random.normal(kb2, (C_out,), dtype=jnp.float32) * 0.1

    out = simple_seg_head(x, w1, b1, w2, b2)
    out = jax.block_until_ready(out)

    ref = _reference(x, w1, b1, w2, b2)
    assert out.shape == (N, C_out, H, W), out.shape
    assert jnp.allclose(out, ref, atol=1e-5, rtol=1e-5), "mismatch vs reference"

    print("KERNEL_OK")
</pallas_src>

<mosaic_0001>
module attributes {stable_mosaic.version = 11 : i64} {
  func.func @_seg_head_kernel(%arg0: i32, %arg1: i32, %arg2: memref<1x4x128xf32, #tpu.memory_space<vmem>>, %arg3: memref<32x4xf32, #tpu.memory_space<vmem>>, %arg4: memref<32x1xf32, #tpu.memory_space<vmem>>, %arg5: memref<3x32xf32, #tpu.memory_space<vmem>>, %arg6: memref<3x1xf32, #tpu.memory_space<vmem>>, %arg7: memref<1x3x128xf32, #tpu.memory_space<vmem>>) attributes {dimension_semantics = [#tpu.dimension_semantics<parallel>, #tpu.dimension_semantics<parallel>], iteration_bounds = array<i64: 2, 2>, scalar_prefetch = 0 : i64, scratch_operands = 0 : i64, tpu.core_type = #tpu.core_type<tc>, window_params = [{transform_indices = @transform_0, window_bounds = array<i64: 1, 4, 128>}, {pipeline_mode = #tpu.pipeline_mode<synchronous>, transform_indices = @transform_1, window_bounds = array<i64: 32, 4>}, {pipeline_mode = #tpu.pipeline_mode<synchronous>, transform_indices = @transform_2, window_bounds = array<i64: 32, 1>}, {pipeline_mode = #tpu.pipeline_mode<synchronous>, transform_indices = @transform_3, window_bounds = array<i64: 3, 32>}, {pipeline_mode = #tpu.pipeline_mode<synchronous>, transform_indices = @transform_4, window_bounds = array<i64: 3, 1>}, {transform_indices = @transform_5, window_bounds = array<i64: 1, 3, 128>}]} {
    %c0 = arith.constant 0 : index
    %c0_0 = arith.constant 0 : index
    %0 = vector.load %arg3[%c0, %c0_0] : memref<32x4xf32, #tpu.memory_space<vmem>>, vector<32x4xf32>
    %c0_1 = arith.constant 0 : index
    %c0_2 = arith.constant 0 : index
    %1 = vector.load %arg5[%c0_1, %c0_2] : memref<3x32xf32, #tpu.memory_space<vmem>>, vector<3x32xf32>
    %c0_3 = arith.constant 0 : index
    %c0_4 = arith.constant 0 : index
    %2 = vector.load %arg4[%c0_3, %c0_4] : memref<32x1xf32, #tpu.memory_space<vmem>>, vector<32x1xf32>
    %3 = vector.shape_cast %2 : vector<32x1xf32> to vector<32x1xf32>
    %4 = vector.broadcast %3 : vector<32x1xf32> to vector<32x128xf32>
    %c0_5 = arith.constant 0 : index
    %c0_6 = arith.constant 0 : index
    %5 = vector.load %arg6[%c0_5, %c0_6] : memref<3x1xf32, #tpu.memory_space<vmem>>, vector<3x1xf32>
    %6 = vector.shape_cast %5 : vector<3x1xf32> to vector<3x1xf32>
    %7 = vector.broadcast %6 : vector<3x1xf32> to vector<3x128xf32>
    %c0_i32 = arith.constant 0 : i32
    %c128_i32 = arith.constant 128 : i32
    %8 = arith.muli %c0_i32, %c128_i32 : i32
    %9 = tpu.assume_multiple %8, 128 : i32
    %c0_7 = arith.constant 0 : index
    %c0_8 = arith.constant 0 : index
    %10 = arith.index_cast %9 : i32 to index
    %11 = vector.load %arg2[%c0_7, %c0_8, %10] : memref<1x4x128xf32, #tpu.memory_space<vmem>>, vector<1x4x128xf32>
    %12 = vector.shape_cast %11 : vector<1x4x128xf32> to vector<4x128xf32>
    %cst = arith.constant dense<0.000000e+00> : vector<32x128xf32>
    %13 = tpu.matmul %0, %12, %cst {dimension_numbers = #tpu.dot_dimension_numbers<[1], [0], [0], [1], [0, 0, 1, 1], [], []>} : vector<32x4xf32>, vector<4x128xf32>, vector<32x128xf32> -> vector<32x128xf32>
    %14 = arith.addf %13, %4 : vector<32x128xf32>
    %cst_9 = arith.constant 0.000000e+00 : f32
    %15 = vector.broadcast %cst_9 : f32 to vector<32x128xf32>
    %16 = arith.maximumf %14, %15 : vector<32x128xf32>
    %cst_10 = arith.constant dense<0.000000e+00> : vector<3x128xf32>
    %17 = tpu.matmul %1, %16, %cst_10 {dimension_numbers = #tpu.dot_dimension_numbers<[1], [0], [0], [1], [0, 0, 1, 1], [], []>} : vector<3x32xf32>, vector<32x128xf32>, vector<3x128xf32> -> vector<3x128xf32>
    %18 = arith.addf %17, %7 : vector<3x128xf32>
    %19 = arith.negf %18 : vector<3x128xf32>
    %20 = math.exp %19 : vector<3x128xf32>
    %cst_11 = arith.constant 1.000000e+00 : f32
    %21 = vector.broadcast %cst_11 : f32 to vector<3x128xf32>
    %22 = arith.addf %21, %20 : vector<3x128xf32>
    %23 = arith.divf %21, %22 : vector<3x128xf32>
    %c0_12 = arith.constant 0 : index
    %c0_13 = arith.constant 0 : index
    %24 = arith.index_cast %9 : i32 to index
    %25 = vector.load %arg7[%c0_12, %c0_13, %24] : memref<1x3x128xf32, #tpu.memory_space<vmem>>, vector<1x3x128xf32>
    %26 = vector.shape_cast %25 : vector<1x3x128xf32> to vector<3x128xf32>
    %27 = vector.shape_cast %23 : vector<3x128xf32> to vector<1x3x128xf32>
    tpu.vector_store %arg7[%c0_12, %c0_13, %24], %27 {strides = array<i32>} : memref<1x3x128xf32, #tpu.memory_space<vmem>>, vector<1x3x128xf32>,
    %c1_i32 = arith.constant 1 : i32
    return
  }
  func.func @transform_0(%arg0: i32, %arg1: i32) -> (i32, i32, i32) {
    %c0_i32 = arith.constant 0 : i32
    %c0_i32_0 = arith.constant 0 : i32
    return %arg0, %c0_i32, %arg1 : i32, i32, i32
  }
  func.func @transform_1(%arg0: i32, %arg1: i32) -> (i32, i32) {
    %c0_i32 = arith.constant 0 : i32
    %c0_i32_0 = arith.constant 0 : i32
    %c0_i32_1 = arith.constant 0 : i32
    return %c0_i32, %c0_i32_0 : i32, i32
  }
  func.func @transform_2(%arg0: i32, %arg1: i32) -> (i32, i32) {
    %c0_i32 = arith.constant 0 : i32
    %c0_i32_0 = arith.constant 0 : i32
    %c0_i32_1 = arith.constant 0 : i32
    return %c0_i32, %c0_i32_0 : i32, i32
  }
  func.func @transform_3(%arg0: i32, %arg1: i32) -> (i32, i32) {
    %c0_i32 = arith.constant 0 : i32
    %c0_i32_0 = arith.constant 0 : i32
    %c0_i32_1 = arith.constant 0 : i32
    return %c0_i32, %c0_i32_0 : i32, i32
  }
  func.func @transform_4(%arg0: i32, %arg1: i32) -> (i32, i32) {
    %c0_i32 = arith.constant 0 : i32
    %c0_i32_0 = arith.constant 0 : i32
    %c0_i32_1 = arith.constant 0 : i32
    return %c0_i32, %c0_i32_0 : i32, i32
  }
  func.func @transform_5(%arg0: i32, %arg1: i32) -> (i32, i32, i32) {
    %c0_i32 = arith.constant 0 : i32
    %c0_i32_0 = arith.constant 0 : i32
    return %arg0, %c0_i32, %arg1 : i32, i32, i32
  }
}

</mosaic_0001>

<bundles_post_ra>
// kernel: simple_seg_head.1
= control target key start
LH: loop header
LB: loop body
LE: loop exit
PB: predicated region body
PF: predicated region fallthrough
CT: control target
= control target key end

     0   :  { %s611_s18 = smov 0   ;;  %s613_s19 = smov 0   ;;  %s699_s0 = inlined_call_operand.vmem [shape: f32[2,4,256], index: 0, kind: input, shape index: {}]   ;;  %s700_s1 = inlined_call_operand.vmem [shape: f32[32,4], index: 1, kind: input, shape index: {}]   ;;  %s701_s2 = inlined_call_operand.vmem [shape: f32[32,1], index: 2, kind: input, shape index: {}]   ;;  %s702_s3 = inlined_call_operand.vmem [shape: f32[3,32], index: 3, kind: input, shape index: {}]   ;;  %s703_s4 = inlined_call_operand.vmem [shape: f32[3,1], index: 4, kind: input, shape index: {}]   ;;  %s704_s5 = inlined_call_operand.vmem [shape: f32[2,3,256], index: 5, kind: output, shape index: {}]  }
   0x1   :  { %s615_s20 = smov 0   ;;  %s617_s21 = smov 0  }
   0x2   :  { %s619_s22 = smov 0  }
   0x3 LB: > { %s24_s23 = sadd.s32 1, %s570_s20  ;;  %s27_s24 = sadd.s32 1, %s574_s21  ;;  %s578_s22 = sphi %s619_s22, %s15_s22   ;;  %s574_s21 = sphi %s617_s21, %s708_s21   ;;  %s570_s20 = sphi %s615_s20, %s707_s20   ;;  %s566_s19 = sphi %s613_s19, %s706_s19   ;;  %s562_s18 = sphi %s611_s18, %s705_s18  }
   0x4   : > { %p25_p0 = scmp.ge.s32.totalorder %s24_s23, 2  ;;  %p476_p1 = scmp.ge.s32.totalorder %s578_s22, 1 }
   0x5   : > { %p206_p2 = scmp.lt.s32.totalorder %s578_s22, 5 }
   0x6   : > { %s710_s23 = smov (%p25_p0, %s24_s23), 0  ;;  %s712_s24 = smov (!%p25_p0, %s27_s24), %s574_s21 }
   0x7   : > { %p207_p3 = pnand %p476_p1, %p206_p2  ;;  %p29_p4 = scmp.ge.s32.totalorder %s712_s24, 2 }
   0x8   : > { %p240_p5 = scmp.lt.s32.totalorder (!%p207_p3), %s566_s19, 1  ;;  %p242_p6 = scmp.lt.s32.totalorder (!%p207_p3), %s562_s18, 1 }
   0x9   : > { %s714_s24 = smov (%p29_p4, %s712_s24), 0  ;;  %210 = sbr.rel (%p207_p3) target bundleno = 327 (0x147), region = 40 }
   0xe   : > { %v264_v0 = vld [vmem:[%s701_s2 + $0x18] sm:$0xff]  ;;  %s716_s19 = smov (!%p240_p5, %s566_s19), 1  ;;  %v580_v1 = vmov 0   ;;  %v262_v2 = vld [vmem:[%s701_s2 + $0x8] sm:$0xff]  ;;  %s718_s18 = smov (!%p242_p6, %s562_s18), 1  ;;  %vm305_vm0 = vcmask 1043456  }
   0xf   : > { %533 = vset.pattern.permute.xlu0 %v580_v1  ;;  %534 = vset.pattern.permute.xlu1 %v580_v1  ;;  %s477_s29 = sshll.u32 %s716_s19, 1  ;;  %v257_v3 = vld [vmem:[%s700_s1 + $0x8] sm:$0xff]  ;;  %vm292_vm1 = vcmask 31744   ;;  %v259_v4 = vld [vmem:[%s700_s1 + $0x18] sm:$0xff]  ;;  %v263_v6 = vld [vmem:[%s701_s2 + $0x10] sm:$0xff]  ;;  %vm342_vm2 = vcmask 261120  }
  0x10   : > { %282 = vperm.xlu0 %533, %v264_v0   ;;  %272 = vperm.xlu1 %534, %v262_v2   ;;  %s647_s30 = sadd.s32 %s477_s29, %s718_s18  ;;  %v256_v7 = vld [vmem:[%s700_s1] sm:$0xff]  ;;  %v258_v9 = vld [vmem:[%s700_s1 + $0x10] sm:$0xff] }
  0x11   : > { %535 = vset.pattern.permute.xlu2 %v580_v1  ;;  %s478_s6 = sshll.u32 %s647_s30, 2  ;;  %v261_v8 = vld [vmem:[%s701_s2] sm:$0xff] }
  0x12   : > { %s247_s9 = scalar_lea.vmem %s699_s0, %s478_s6  ;;  %v285_v10 = vld [vmem:[%s703_s4] sm:$0x7]  ;;  %s255_s10 = scalar_lea.vmem %s704_s5, %s478_s6 }
  0x13   : > { %v291_v5 = vld [vmem:[%s247_s9] sm:$0xf]  ;;  %288 = vperm.xlu2 %535, %v285_v10  }
  0x14   : > { %490 = vmatpush.msk.msra.mxu2 %vm305_vm0, %v291_v5  ;;  %491 = vmatpush.msk.msra.mxu3 %vm305_vm0, %v291_v5  ;;  %v260_v27 = vld [vmem:[%s702_s3] sm:$0x7] }
  0x15   : > { %483 = vmatmul.msk.f32.vlgmr.msra.gmra.mxu2 %vm292_vm1, %v257_v3  ;;  %485 = vmatmul.msk.f32.vlgmr.msra.gmra.mxu3 %vm292_vm1, %v259_v4 }
  0x16   : > { %481 = vmatpush.msk.msra.mxu0 %vm305_vm0, %v291_v5 }
  0x17   : > { %482 = vmatmul.msk.f32.vlgmr.msra.gmra.mxu0 %vm292_vm1, %v256_v7 }
  0x18   : > { %277 = vperm.xlu0 %533, %v263_v6   ;;  %267 = vperm.xlu1 %534, %v261_v8  }
  0x1d   : > { %484 = vmatmul.msk.f32.gmra.mxu2 %vm292_vm1, %v258_v9 }
  0x6d   : > { %v289_v28 = vpop.permute.xlu2 %288 }
  0x82   : > { %v283_v11 = vpop.permute.xlu0 %282  ;;  %v273_v12 = vpop.permute.xlu1 %272 }
  0x8a   : > { %v278_v17 = vpop.permute.xlu0 %277  ;;  %v268_v18 = vpop.permute.xlu1 %267 }
  0x94   : > { %v326_v19 = vpop.f32.mrf.mxu0 }
  0x95   : > { %v327_v23 = vadd.f32 %v326_v19, %v268_v18 }
  0x97   : > { %v338_v26 = vmax.f32 %v327_v23, 0.0 }
  0x98   : > { %v329_v13 = vpop.f32.mrf.mxu2  ;;  %v335_v14 = vpop.f32.mrf.mxu3 }
  0x99   : > { %v336_v15 = vadd.f32 %v335_v14, %v283_v11  ;;  %v330_v21 = vadd.f32 %v329_v13, %v273_v12 }
  0x9b   : > { %v341_v16 = vmax.f32 %v336_v15, 0.0  ;;  %v339_v25 = vmax.f32 %v330_v21, 0.0 }
  0x9d   : > { %358 = vmatpush.msra.mxu1 %v341_v16 }
  0xa0   : > { %v332_v20 = vpop.f32.mrf.mxu2 }
  0xa1   : > { %v333_v22 = vadd.f32 %v332_v20, %v278_v17 }
  0xa3   : > { %v340_v24 = vmax.f32 %v333_v22, 0.0 }
  0xa5   : > { %359 = vmatpush.msra.mxu1 %v340_v24 }
  0xa7   : > { %360 = vmatpush.msra.mxu1 %v339_v25 }
  0xa9   : > { %361 = vmatpush.msra.mxu1 %v338_v26 }
  0xaa   : > { %486 = vmatmul.msk.f32.vlgmr.msra.gmra.mxu1 %vm342_vm2, %v260_v27 }
 0x127   : > { %v363_v29 = vpop.f32.mrf.mxu1 }
 0x128   : > { %v364_v30 = vadd.f32 %v363_v29, %v289_v28 }
 0x12a   : > { %v487_v31 = vmul.f32 -1.442695, %v364_v30 }
 0x12c   : > { %536 = vpow2.f32 %v487_v31 }
 0x132   : > { %v537_v32 = vpop.eup %536 }
 0x133   : > { %v369_v33 = vadd.f32 1.0, %v537_v32 }
 0x135   : > { %538 = vrcp.f32 %v369_v33  ;;  %v381_v37 = vand.u32 2147483648, %v369_v33  ;;  %v379_v39 = vand.u32 2147483647, %v369_v33  ;;  %vm375_vm4 = vweird.f32 %v369_v33 }
 0x137   : > { %v382_v41 = vor.u32 1.1754944e-38, %v381_v37  ;;  %vm380_vm6 = vcmp.eq.f32.partialorder %v379_v39, 8.507059e+37 }
 0x13b   : > { %v539_v34 = vpop.eup %538 }
 0x13c   : > { %v371_v35 = vmul.f32 %v539_v34, %v369_v33  ;;  %vm376_vm3 = vweird.f32 %v539_v34 }
 0x13d   : > { %vm377_vm5 = vmor %vm375_vm4, %vm376_vm3 }
 0x13e   : > { %v372_v36 = vsub.f32 1.0, %v371_v35 }
 0x140   : > { %v373_v38 = vmul.f32 %v539_v34, %v372_v36 }
 0x142   : > { %v374_v40 = vadd.f32 %v539_v34, %v373_v38 }
 0x144   : > { %v378_v42 = vsel %vm377_vm5, %v539_v34, %v374_v40 }
 0x145   : > { %v383_v43 = vsel %vm380_vm6, %v382_v41, %v378_v42 }
 0x146   : > { %385 = vst [vmem:[%s255_s10] sm:$0x7] %v383_v43 }
 0x147 PF: > { %s15_s22 = sadd.s32 1, %s578_s22   ;;  %s705_s18 = smov %s570_s20 }
 0x148   : > { %p12_p7 = scmp.ge.s32.totalorder %s15_s22, 6   ;;  %s706_s19 = smov %s574_s21 }
 0x149   : > { %s707_s20 = smov %s710_s23  ;;  %s708_s21 = smov %s714_s24 }
 0x14a   :  { %14 = sbr.rel (!%p12_p7) target bundleno = 3 (0x3), region = 70 }

</bundles_post_ra>
